<compile_context>
chip_gen: v7x
topology: tpu7x:2x2x1
jax: 0.10.0
libtpu: 0.0.40
codegen_flags: <defaults>
</compile_context>

<pallas_src>
import functools

import jax
import jax.numpy as jnp
from jax.experimental import pallas as pl
from jax.experimental.pallas import tpu as pltpu


# ---------------------------------------------------------------------------
# Kernels
# ---------------------------------------------------------------------------

def _se_fused_kernel(x_ref, w1_ref, b1_ref, w2_ref, b2_ref, o_ref, *, inv_hw):
    """Fused pool + FC + gate for NB whole images resident in VMEM.

    x_ref/o_ref: (NB, C, HW) in the I/O dtype (the slab is never upcast).
    w1_ref: (Cr, C)  b1_ref: (Cr, 1) f32  w2_ref: (C, Cr)  b2_ref: (C, 1) f32.
    """
    nb = x_ref.shape[0]
    for n in range(nb):                      # static unroll; images independent
        # Global average pool with f32 accumulation.  Only one image is upcast
        # at a time and the f32 temp dies at the sum (never the whole slab).
        mean = jnp.sum(x_ref[n].astype(jnp.float32), axis=1,
                       keepdims=True) * inv_hw                         # (C, 1)
        # fc1 (1x1 conv) + ReLU.  Weights keep their own dtype; the MXU
        # accumulates in f32 via preferred_element_type.
        h = jnp.maximum(
            jnp.dot(w1_ref[...], mean.astype(w1_ref.dtype),
                    preferred_element_type=jnp.float32) + b1_ref[...], 0.0)
        # fc2 (1x1 conv) + sigmoid.
        s = jax.nn.sigmoid(
            jnp.dot(w2_ref[...], h.astype(w2_ref.dtype),
                    preferred_element_type=jnp.float32) + b2_ref[...])  # (C, 1)
        # Gate in the I/O dtype: re-read x_ref (VMEM reads are cheap, 3 vld
        # slots/cycle) instead of keeping an upcast copy live.
        o_ref[n] = x_ref[n] * s.astype(o_ref.dtype)


def _se_pool_kernel(x_ref, s_ref, *, hw_total):
    """Two-pass path, pass 1: streamed global-average-pool (sums only).

    Grid (N, num_hw_tiles); x_ref: (1, C, thw); s_ref: (1, C, 1) f32 running
    sum (output block revisited across the h axis).  The FCs are hoisted out
    of this kernel (one tiny batched XLA matmul between the passes), so no
    weights occupy VMEM here and the spatial tile can be larger.
    """
    h_idx = pl.program_id(1)
    x = x_ref[0]                                                     # (C, thw)
    thw = x.shape[1]
    if hw_total % thw != 0:
        # Mask the out-of-range lanes of the (padded) spatial edge tile.
        lane = jax.lax.broadcasted_iota(jnp.int32, (1, thw), 1)
        x = jnp.where(h_idx * thw + lane < hw_total, x, 0)
    part = jnp.sum(x.astype(jnp.float32), axis=1, keepdims=True)     # (C, 1)

    @pl.when(h_idx == 0)
    def _init():
        s_ref[0] = part

    @pl.when(h_idx != 0)
    def _accumulate():
        s_ref[0] = s_ref[0] + part


def _se_gate_kernel(x_ref, s_ref, o_ref):
    """Two-pass path, pass 2: y = x * s, entirely in the I/O dtype."""
    o_ref[0] = x_ref[0] * s_ref[0]           # (C, thw) * (C, 1) broadcast


# ---------------------------------------------------------------------------
# pallas_call wrappers
# ---------------------------------------------------------------------------

def _se_fused(x3, w1, b1f, w2, b2f, *, nb, inv_hw, vmem_limit):
    N, C, HW = x3.shape
    Cr = w1.shape[0]
    blk = (nb, C, HW)
    kernel = functools.partial(_se_fused_kernel, inv_hw=inv_hw)
    return pl.pallas_call(
        kernel,
        out_shape=jax.ShapeDtypeStruct(x3.shape, x3.dtype),
        grid_spec=pltpu.PrefetchScalarGridSpec(
            num_scalar_prefetch=0,
            grid=(pl.cdiv(N, nb),),          # ragged last block tolerated
            in_specs=[
                pl.BlockSpec(blk, lambda n: (n, 0, 0)),
                pl.BlockSpec((Cr, C), lambda n: (0, 0)),
                pl.BlockSpec((Cr, 1), lambda n: (0, 0)),
                pl.BlockSpec((C, Cr), lambda n: (0, 0)),
                pl.BlockSpec((C, 1), lambda n: (0, 0)),
            ],
            out_specs=pl.BlockSpec(blk, lambda n: (n, 0, 0)),
        ),
        compiler_params=pltpu.CompilerParams(
            dimension_semantics=("parallel",),
            vmem_limit_bytes=vmem_limit),
    )(x3, w1, b1f, w2, b2f)


def _se_two_pass(x3, w1, b1, w2, b2, *, thw_pool, thw_gate, vmem_limit):
    N, C, HW = x3.shape

    # ---- pass 1: per-image pooled sums (no weights in VMEM) ----------------
    pool_kernel = functools.partial(_se_pool_kernel, hw_total=HW)
    sums = pl.pallas_call(
        pool_kernel,
        out_shape=jax.ShapeDtypeStruct((N, C, 1), jnp.float32),
        grid_spec=pltpu.PrefetchScalarGridSpec(
            num_scalar_prefetch=0,
            grid=(N, pl.cdiv(HW, thw_pool)),
            in_specs=[pl.BlockSpec((1, C, thw_pool), lambda n, h: (n, 0, h))],
            out_specs=pl.BlockSpec((1, C, 1), lambda n, h: (n, 0, 0)),
        ),
        compiler_params=pltpu.CompilerParams(
            dimension_semantics=("parallel", "arbitrary"),
            vmem_limit_bytes=vmem_limit),
    )(x3)

    # ---- FCs hoisted out of the kernel: one small batched XLA matmul -------
    mean = sums.reshape(N, C) * (1.0 / HW)
    h = jnp.maximum(
        jnp.dot(mean, jnp.asarray(w1, jnp.float32).T)
        + jnp.asarray(b1, jnp.float32), 0.0)
    s = jax.nn.sigmoid(
        jnp.dot(h, jnp.asarray(w2, jnp.float32).T)
        + jnp.asarray(b2, jnp.float32))
    s = s.astype(x3.dtype).reshape(N, C, 1)   # pre-cast once; gate in I/O dtype

    # ---- pass 2: fully tiled, parallel gating ------------------------------
    return pl.pallas_call(
        _se_gate_kernel,
        out_shape=jax.ShapeDtypeStruct((N, C, HW), x3.dtype),
        grid_spec=pltpu.PrefetchScalarGridSpec(
            num_scalar_prefetch=0,
            grid=(N, pl.cdiv(HW, thw_gate)),
            in_specs=[pl.BlockSpec((1, C, thw_gate), lambda n, h: (n, 0, h)),
                      pl.BlockSpec((1, C, 1), lambda n, h: (n, 0, 0))],
            out_specs=pl.BlockSpec((1, C, thw_gate), lambda n, h: (n, 0, h)),
        ),
        compiler_params=pltpu.CompilerParams(
            dimension_semantics=("parallel", "parallel"),
            vmem_limit_bytes=vmem_limit),
    )(x3, s)


# ---------------------------------------------------------------------------
# Device queries & planning helpers
# ---------------------------------------------------------------------------

def _round_up(v, m):
    return ((v + m - 1) // m) * m


def _vmem_capacity_bytes():
    try:
        info = pltpu.get_tpu_info()
        cap = int(getattr(info, "vmem_capacity_bytes", 0) or 0)
        if cap > 0:
            return cap
    except Exception:
        pass
    # Fallback keyed on device_kind so a failed query on a 128 MiB part does
    # not silently halve the budget (and push mid-size shapes to 3 HBM passes).
    try:
        kind = jax.devices()[0].device_kind.lower()
    except Exception:
        kind = ""
    if "v7" in kind:
        return 64 * 1024 * 1024
    if "v5" in kind or "v6" in kind:
        return 128 * 1024 * 1024
    return 64 * 1024 * 1024            # conservative default


def _num_tensorcores():
    """TensorCores per chip (2 on v7x, 1 on v5e/v6e)."""
    try:
        kind = jax.devices()[0].device_kind.lower()
    except Exception:
        kind = ""
    return 2 if "v7" in kind else 1


# ---------------------------------------------------------------------------
# Public wrapper
# ---------------------------------------------------------------------------

def squeeze_and_excitation(x_nchw, w1, b1, w2, b2, *, max_vmem_bytes=None,
                           _force_two_pass=False, _batch_tile=None,
                           _pool_tile=None, _gate_tile=None):
    """SE forward pass.

    x_nchw: (N, C, H, W); w1: (Cr, C); b1: (Cr,); w2: (C, Cr); b2: (C,).
    Returns y with the same shape and dtype as x_nchw.
    Underscore-prefixed keyword args are test / tuning overrides only.
    """
    N, C, H, W = x_nchw.shape
    Cr = w1.shape[0]
    HW = H * W
    itemsize = jnp.dtype(x_nchw.dtype).itemsize
    w_itemsize = jnp.dtype(w1.dtype).itemsize

    # VMEM planning: ask the compiler for 3/4 of capacity, plan only to 5/8 so
    # Mosaic keeps scratch/pipelining headroom.
    cap = _vmem_capacity_bytes()
    vmem_limit = (3 * cap) // 4
    budget = (5 * cap) // 8
    if max_vmem_bytes is not None:
        budget = min(budget, int(max_vmem_bytes))

    # Channels-first (N, C, HW) always: a free reshape from NCHW.  (The old
    # channels-last variant cost two full extra HBM passes of x in wrapper
    # transposes — more traffic than the SE op itself — so it was dropped;
    # HW < 128 just uses masked lane stores.)
    x3 = x_nchw.reshape(N, C, HW)

    # VMEM footprints use padded (sublane, lane) tile sizes, not logical sizes.
    sub = {4: 8, 2: 16, 1: 32}.get(itemsize, 8)
    w_sub = {4: 8, 2: 16, 1: 32}.get(w_itemsize, 8)
    c_pad = _round_up(C, sub)
    hw_pad = _round_up(HW, 128)
    slab = c_pad * hw_pad * itemsize                 # one image, I/O dtype
    f32_slab = _round_up(C, 8) * hw_pad * 4          # one image, f32 pool temp
    weight_vmem = (_round_up(Cr, w_sub) * _round_up(C, 128) * w_itemsize
                   + _round_up(C, w_sub) * _round_up(Cr, 128) * w_itemsize
                   + (_round_up(Cr, 8) + _round_up(C, 8)) * 128 * 4)
    slack = 128 * 1024

    # Fused path needs: double-buffered in+out blocks (4*nb*slab), resident
    # weights (2x for double-buffering), plus <= 1 image of in-kernel temps
    # (f32 pool temp when I/O is sub-32-bit, and the pre-store gate product).
    extra = (f32_slab if itemsize < 4 else 0) + slab
    avail_fused = budget - 2 * weight_vmem - slack
    nb_budget = (avail_fused - extra) // (4 * slab) if avail_fused > extra else 0

    num_tc = _num_tensorcores()

    if nb_budget >= 1 and not _force_two_pass:
        # -------- fused single pass: pool + FC + gate, 2 HBM passes ---------
        nb = min(int(nb_budget), N, 64)      # 64 caps code-size of the unroll
        if num_tc >= 2 and N >= 2:
            nb = min(nb, (N + 1) // 2)       # keep >= 2 grid steps for 2 TCs
        if _batch_tile is not None:
            nb = max(1, min(int(_batch_tile), N))
        nb = max(1, nb)
        # TODO(synk): for N == 1 on dual-TensorCore parts, split the spatial
        # axis across cores instead of leaving one TC (and its HBM pipe) idle.
        b1f = jnp.asarray(b1, jnp.float32).reshape(Cr, 1)
        b2f = jnp.asarray(b2, jnp.float32).reshape(C, 1)
        out3 = _se_fused(x3, jnp.asarray(w1), b1f, jnp.asarray(w2), b2f,
                         nb=nb, inv_hw=1.0 / HW, vmem_limit=vmem_limit)
        return out3.reshape(N, C, H, W)

    # -------- two-pass path: per-image slab too big for VMEM ----------------
    # Pass 1 streams x once to build per-image pooled sums (input is the only
    # tiled, double-buffered operand -> ~2x larger tiles than the gate pass);
    # the FCs run as one tiny batched XLA matmul; pass 2 streams x again and
    # multiplies in the I/O dtype.  ~1.5x the HBM reads of the fused path but
    # keeps double-buffered pipelining at any C*HW.
    avail = budget - slack
    if _pool_tile is not None:
        thw_pool = int(_pool_tile)
    else:
        # 2x double-buffered native input + masked native copy + f32 temp.
        thw_pool = avail // (c_pad * (3 * itemsize + 4))
        thw_pool = max(128, (thw_pool // 128) * 128)
    thw_pool = min(thw_pool, HW)

    if _gate_tile is not None:
        thw_gate = int(_gate_tile)
    else:
        # 4x double-buffered in/out + pre-store product, minus the resident
        # per-image gate-vector block.
        avail_gate = avail - 2 * c_pad * 128 * itemsize
        thw_gate = avail_gate // (c_pad * 5 * itemsize)
        thw_gate = max(128, (thw_gate // 128) * 128)
    thw_gate = min(thw_gate, HW)
    # TODO(synk): also tile the channel axis if even a (C, 128) tile overflows
    # the VMEM budget (very large C).

    out3 = _se_two_pass(x3, w1, b1, w2, b2, thw_pool=thw_pool,
                        thw_gate=thw_gate, vmem_limit=vmem_limit)
    return out3.reshape(N, C, H, W)


# ---------------------------------------------------------------------------
# Reference + self-test
# ---------------------------------------------------------------------------

def _reference(x, w1, b1, w2, b2):
    """Pure-JAX reference (f32 math, output cast back to x.dtype)."""
    xf = x.astype(jnp.float32)
    m = jnp.mean(xf, axis=(2, 3))                                     # (N, C)
    h = jnp.maximum(m @ w1.astype(jnp.float32).T + b1.astype(jnp.float32), 0.0)
    s = jax.nn.sigmoid(h @ w2.astype(jnp.float32).T + b2.astype(jnp.float32))
    return (xf * s[:, :, None, None]).astype(x.dtype)


if __name__ == "__main__":
    root = jax.random.PRNGKey(0)

    def run_case(key, N, C, H, W, reduction=4, dtype=jnp.float32,
                 atol=2e-5, rtol=1e-5, **kw):
        Cr = max(1, C // reduction)
        kx, k1, kb1, k2, kb2 = jax.random.split(key, 5)
        x = jax.random.normal(kx, (N, C, H, W), jnp.float32).astype(dtype)
        w1 = (jax.random.normal(k1, (Cr, C), jnp.float32) * 0.5).astype(dtype)
        b1 = (jax.random.normal(kb1, (Cr,), jnp.float32) * 0.1).astype(dtype)
        w2 = (jax.random.normal(k2, (C, Cr), jnp.float32) * 0.5).astype(dtype)
        b2 = (jax.random.normal(kb2, (C,), jnp.float32) * 0.1).astype(dtype)
        y = squeeze_and_excitation(x, w1, b1, w2, b2, **kw)
        y = jax.block_until_ready(y)
        y_ref = _reference(x, w1, b1, w2, b2)
        assert y.shape == x.shape and y.dtype == x.dtype
        assert jnp.allclose(y.astype(jnp.float32), y_ref.astype(jnp.float32),
                            atol=atol, rtol=rtol), \
            f"mismatch vs reference at N={N} C={C} H={H} W={W} dtype={dtype}"

    keys = jax.random.split(root, 5)
    # 1) Spec shape: fused path, HW=256 on the lane axis.
    run_case(keys[0], 2, 4, 16, 16)
    # 2) HW < 128 with C >= 128: still channels-first fused (no transposes).
    run_case(keys[1], 2, 256, 8, 8)
    # 3) Forced two-pass path: masked partial spatial edge tile in the pool
    #    pass (HW=1024, thw_pool=384) and a padded gate edge tile (640).
    run_case(keys[2], 2, 8, 32, 32, _force_two_pass=True,
             _pool_tile=384, _gate_tile=640)
    # 4) bf16 I/O and bf16 weights; pooling / FC accumulation stays f32.
    run_case(keys[3], 2, 128, 8, 8, dtype=jnp.bfloat16, atol=3e-2, rtol=3e-2)
    # 5) Ragged batch blocks: N=5 with nb=2 -> grid cdiv(5,2)=3, last block
    #    padded (garbage rows computed but their outputs dropped).
    run_case(keys[4], 5, 16, 8, 8, _batch_tile=2)

    print("KERNEL_OK")
</pallas_src>

<mosaic_0001>
module attributes {stable_mosaic.version = 11 : i64} {
  func.func @_se_fused_kernel(%arg0: i32, %arg1: memref<2x4x256xf32, #tpu.memory_space<vmem>>, %arg2: memref<1x4xf32, #tpu.memory_space<vmem>>, %arg3: memref<1x1xf32, #tpu.memory_space<vmem>>, %arg4: memref<4x1xf32, #tpu.memory_space<vmem>>, %arg5: memref<4x1xf32, #tpu.memory_space<vmem>>, %arg6: memref<2x4x256xf32, #tpu.memory_space<vmem>>) attributes {dimension_semantics = [#tpu.dimension_semantics<parallel>], iteration_bounds = array<i64: 1>, scalar_prefetch = 0 : i64, scratch_operands = 0 : i64, tpu.core_type = #tpu.core_type<tc>, window_params = [{transform_indices = @transform_0, window_bounds = array<i64: 2, 4, 256>}, {pipeline_mode = #tpu.pipeline_mode<synchronous>, transform_indices = @transform_1, window_bounds = array<i64: 1, 4>}, {pipeline_mode = #tpu.pipeline_mode<synchronous>, transform_indices = @transform_2, window_bounds = array<i64: 1, 1>}, {pipeline_mode = #tpu.pipeline_mode<synchronous>, transform_indices = @transform_3, window_bounds = array<i64: 4, 1>}, {pipeline_mode = #tpu.pipeline_mode<synchronous>, transform_indices = @transform_4, window_bounds = array<i64: 4, 1>}, {transform_indices = @transform_5, window_bounds = array<i64: 2, 4, 256>}]} {
    %c0 = arith.constant 0 : index
    %c0_0 = arith.constant 0 : index
    %c0_1 = arith.constant 0 : index
    %0 = vector.load %arg1[%c0, %c0_0, %c0_1] : memref<2x4x256xf32, #tpu.memory_space<vmem>>, vector<1x4x256xf32>
    %1 = vector.shape_cast %0 : vector<1x4x256xf32> to vector<4x256xf32>
    %cst = arith.constant dense<0.000000e+00> : vector<4xf32>
    %2 = vector.multi_reduction <add>, %1, %cst [1] : vector<4x256xf32> to vector<4xf32>
    %3 = vector.shape_cast %2 : vector<4xf32> to vector<4x1xf32>
    %cst_2 = arith.constant 3.906250e-03 : f32
    %4 = vector.broadcast %cst_2 : f32 to vector<4x1xf32>
    %5 = arith.mulf %3, %4 : vector<4x1xf32>
    %c0_3 = arith.constant 0 : index
    %c0_4 = arith.constant 0 : index
    %6 = vector.load %arg2[%c0_3, %c0_4] : memref<1x4xf32, #tpu.memory_space<vmem>>, vector<1x4xf32>
    %cst_5 = arith.constant dense<0.000000e+00> : vector<1x1xf32>
    %7 = tpu.matmul %6, %5, %cst_5 {dimension_numbers = #tpu.dot_dimension_numbers<[1], [0], [0], [1], [0, 0, 1, 1], [], []>} : vector<1x4xf32>, vector<4x1xf32>, vector<1x1xf32> -> vector<1x1xf32>
    %c0_6 = arith.constant 0 : index
    %c0_7 = arith.constant 0 : index
    %8 = vector.load %arg3[%c0_6, %c0_7] : memref<1x1xf32, #tpu.memory_space<vmem>>, vector<1x1xf32>
    %9 = arith.addf %7, %8 : vector<1x1xf32>
    %cst_8 = arith.constant 0.000000e+00 : f32
    %10 = vector.broadcast %cst_8 : f32 to vector<1x1xf32>
    %11 = arith.maximumf %9, %10 : vector<1x1xf32>
    %c0_9 = arith.constant 0 : index
    %c0_10 = arith.constant 0 : index
    %12 = vector.load %arg4[%c0_9, %c0_10] : memref<4x1xf32, #tpu.memory_space<vmem>>, vector<4x1xf32>
    %cst_11 = arith.constant dense<0.000000e+00> : vector<4x1xf32>
    %13 = tpu.matmul %12, %11, %cst_11 {dimension_numbers = #tpu.dot_dimension_numbers<[1], [0], [0], [1], [0, 0, 1, 1], [], []>} : vector<4x1xf32>, vector<1x1xf32>, vector<4x1xf32> -> vector<4x1xf32>
    %c0_12 = arith.constant 0 : index
    %c0_13 = arith.constant 0 : index
    %14 = vector.load %arg5[%c0_12, %c0_13] : memref<4x1xf32, #tpu.memory_space<vmem>>, vector<4x1xf32>
    %15 = arith.addf %13, %14 : vector<4x1xf32>
    %16 = arith.negf %15 : vector<4x1xf32>
    %17 = math.exp %16 : vector<4x1xf32>
    %cst_14 = arith.constant 1.000000e+00 : f32
    %18 = vector.broadcast %cst_14 : f32 to vector<4x1xf32>
    %19 = arith.addf %18, %17 : vector<4x1xf32>
    %20 = arith.divf %18, %19 : vector<4x1xf32>
    %c0_15 = arith.constant 0 : index
    %c0_16 = arith.constant 0 : index
    %c0_17 = arith.constant 0 : index
    %21 = vector.load %arg1[%c0_15, %c0_16, %c0_17] : memref<2x4x256xf32, #tpu.memory_space<vmem>>, vector<1x4x256xf32>
    %22 = vector.shape_cast %21 : vector<1x4x256xf32> to vector<4x256xf32>
    %23 = vector.broadcast %20 : vector<4x1xf32> to vector<4x256xf32>
    %24 = arith.mulf %22, %23 : vector<4x256xf32>
    %c0_18 = arith.constant 0 : index
    %c0_19 = arith.constant 0 : index
    %c0_20 = arith.constant 0 : index
    %25 = vector.load %arg6[%c0_18, %c0_19, %c0_20] : memref<2x4x256xf32, #tpu.memory_space<vmem>>, vector<1x4x256xf32>
    %26 = vector.shape_cast %25 : vector<1x4x256xf32> to vector<4x256xf32>
    %27 = vector.shape_cast %24 : vector<4x256xf32> to vector<1x4x256xf32>
    tpu.vector_store %arg6[%c0_18, %c0_19, %c0_20], %27 {strides = array<i32>} : memref<2x4x256xf32, #tpu.memory_space<vmem>>, vector<1x4x256xf32>,
    %c1 = arith.constant 1 : index
    %c0_21 = arith.constant 0 : index
    %c0_22 = arith.constant 0 : index
    %28 = vector.load %arg1[%c1, %c0_21, %c0_22] : memref<2x4x256xf32, #tpu.memory_space<vmem>>, vector<1x4x256xf32>
    %29 = vector.shape_cast %28 : vector<1x4x256xf32> to vector<4x256xf32>
    %cst_23 = arith.constant dense<0.000000e+00> : vector<4xf32>
    %30 = vector.multi_reduction <add>, %29, %cst_23 [1] : vector<4x256xf32> to vector<4xf32>
    %31 = vector.shape_cast %30 : vector<4xf32> to vector<4x1xf32>
    %cst_24 = arith.constant 3.906250e-03 : f32
    %32 = vector.broadcast %cst_24 : f32 to vector<4x1xf32>
    %33 = arith.mulf %31, %32 : vector<4x1xf32>
    %c0_25 = arith.constant 0 : index
    %c0_26 = arith.constant 0 : index
    %34 = vector.load %arg2[%c0_25, %c0_26] : memref<1x4xf32, #tpu.memory_space<vmem>>, vector<1x4xf32>
    %cst_27 = arith.constant dense<0.000000e+00> : vector<1x1xf32>
    %35 = tpu.matmul %34, %33, %cst_27 {dimension_numbers = #tpu.dot_dimension_numbers<[1], [0], [0], [1], [0, 0, 1, 1], [], []>} : vector<1x4xf32>, vector<4x1xf32>, vector<1x1xf32> -> vector<1x1xf32>
    %c0_28 = arith.constant 0 : index
    %c0_29 = arith.constant 0 : index
    %36 = vector.load %arg3[%c0_28, %c0_29] : memref<1x1xf32, #tpu.memory_space<vmem>>, vector<1x1xf32>
    %37 = arith.addf %35, %36 : vector<1x1xf32>
    %cst_30 = arith.constant 0.000000e+00 : f32
    %38 = vector.broadcast %cst_30 : f32 to vector<1x1xf32>
    %39 = arith.maximumf %37, %38 : vector<1x1xf32>
    %c0_31 = arith.constant 0 : index
    %c0_32 = arith.constant 0 : index
    %40 = vector.load %arg4[%c0_31, %c0_32] : memref<4x1xf32, #tpu.memory_space<vmem>>, vector<4x1xf32>
    %cst_33 = arith.constant dense<0.000000e+00> : vector<4x1xf32>
    %41 = tpu.matmul %40, %39, %cst_33 {dimension_numbers = #tpu.dot_dimension_numbers<[1], [0], [0], [1], [0, 0, 1, 1], [], []>} : vector<4x1xf32>, vector<1x1xf32>, vector<4x1xf32> -> vector<4x1xf32>
    %c0_34 = arith.constant 0 : index
    %c0_35 = arith.constant 0 : index
    %42 = vector.load %arg5[%c0_34, %c0_35] : memref<4x1xf32, #tpu.memory_space<vmem>>, vector<4x1xf32>
    %43 = arith.addf %41, %42 : vector<4x1xf32>
    %44 = arith.negf %43 : vector<4x1xf32>
    %45 = math.exp %44 : vector<4x1xf32>
    %cst_36 = arith.constant 1.000000e+00 : f32
    %46 = vector.broadcast %cst_36 : f32 to vector<4x1xf32>
    %47 = arith.addf %46, %45 : vector<4x1xf32>
    %48 = arith.divf %46, %47 : vector<4x1xf32>
    %c1_37 = arith.constant 1 : index
    %c0_38 = arith.constant 0 : index
    %c0_39 = arith.constant 0 : index
    %49 = vector.load %arg1[%c1_37, %c0_38, %c0_39] : memref<2x4x256xf32, #tpu.memory_space<vmem>>, vector<1x4x256xf32>
    %50 = vector.shape_cast %49 : vector<1x4x256xf32> to vector<4x256xf32>
    %51 = vector.broadcast %48 : vector<4x1xf32> to vector<4x256xf32>
    %52 = arith.mulf %50, %51 : vector<4x256xf32>
    %c1_40 = arith.constant 1 : index
    %c0_41 = arith.constant 0 : index
    %c0_42 = arith.constant 0 : index
    %53 = vector.load %arg6[%c1_40, %c0_41, %c0_42] : memref<2x4x256xf32, #tpu.memory_space<vmem>>, vector<1x4x256xf32>
    %54 = vector.shape_cast %53 : vector<1x4x256xf32> to vector<4x256xf32>
    %55 = vector.shape_cast %52 : vector<4x256xf32> to vector<1x4x256xf32>
    tpu.vector_store %arg6[%c1_40, %c0_41, %c0_42], %55 {strides = array<i32>} : memref<2x4x256xf32, #tpu.memory_space<vmem>>, vector<1x4x256xf32>,
    return
  }
  func.func @transform_0(%arg0: i32) -> (i32, i32, i32) {
    %c0_i32 = arith.constant 0 : i32
    %c0_i32_0 = arith.constant 0 : i32
    %c0_i32_1 = arith.constant 0 : i32
    return %arg0, %c0_i32, %c0_i32_0 : i32, i32, i32
  }
  func.func @transform_1(%arg0: i32) -> (i32, i32) {
    %c0_i32 = arith.constant 0 : i32
    %c0_i32_0 = arith.constant 0 : i32
    %c0_i32_1 = arith.constant 0 : i32
    return %c0_i32, %c0_i32_0 : i32, i32
  }
  func.func @transform_2(%arg0: i32) -> (i32, i32) {
    %c0_i32 = arith.constant 0 : i32
    %c0_i32_0 = arith.constant 0 : i32
    %c0_i32_1 = arith.constant 0 : i32
    return %c0_i32, %c0_i32_0 : i32, i32
  }
  func.func @transform_3(%arg0: i32) -> (i32, i32) {
    %c0_i32 = arith.constant 0 : i32
    %c0_i32_0 = arith.constant 0 : i32
    %c0_i32_1 = arith.constant 0 : i32
    return %c0_i32, %c0_i32_0 : i32, i32
  }
  func.func @transform_4(%arg0: i32) -> (i32, i32) {
    %c0_i32 = arith.constant 0 : i32
    %c0_i32_0 = arith.constant 0 : i32
    %c0_i32_1 = arith.constant 0 : i32
    return %c0_i32, %c0_i32_0 : i32, i32
  }
  func.func @transform_5(%arg0: i32) -> (i32, i32, i32) {
    %c0_i32 = arith.constant 0 : i32
    %c0_i32_0 = arith.constant 0 : i32
    %c0_i32_1 = arith.constant 0 : i32
    return %arg0, %c0_i32, %c0_i32_0 : i32, i32, i32
  }
}

</mosaic_0001>

<bundles_post_ra>
// kernel: tpu_custom_call.1
= control target key start
LH: loop header
LB: loop body
LE: loop exit
PB: predicated region body
PF: predicated region fallthrough
CT: control target
= control target key end

     0   :  { %s651_s0 = inlined_call_operand.hbm [shape: f32[2,4,256], index: 0, kind: input, shape index: {}]   ;;  %s652_s1 = inlined_call_operand.vmem [shape: f32[1,4], index: 1, kind: input, shape index: {}]   ;;  %s653_s2 = inlined_call_operand.<no memory space> [shape: f32[1,1], index: 2, kind: input, shape index: {}]   ;;  %s654_s3 = inlined_call_operand.vmem [shape: f32[4,1], index: 3, kind: input, shape index: {}]   ;;  %s655_s4 = inlined_call_operand.vmem [shape: f32[4,1], index: 4, kind: input, shape index: {}]   ;;  %s656_s5 = inlined_call_operand.hbm [shape: f32[2,4,256], index: 5, kind: output, shape index: {}]  }
   0x1   :  { %v10_v0 = vstv %s653_s2 }
   0x2   :  { %11 = vst [vmem:[#allocation2] sm:$0x1] %v10_v0 }
   0x3   :  { %12 = vsyncpa [#allocation4], 0 }
   0x4   :  { %13 = vsyncpa [#allocation5], 0  ;;  %s540_s20 = smov [#allocation3]   ;;  %s492_s24 = scalar_lea.hbm %s651_s0, 256 }
   0x5   :  { %s19_s21 = sshll.u32 %s540_s20, 4  ;;  %p493_p0 = scmp.ne.s32.totalorder %s651_s0, %s492_s24  ;;  %s20_s21 = int_to_ptr.vmem [resolvable:$true] %s19_s21 }
   0x6   :  { %p496_p1 = scmp.lt.u32.totalorder %s492_s24, %s651_s0 }
   0x8   :  { %p498_p2 = pnand %p496_p1, %p493_p0 }
   0xa   :  { %501 = shalt.err (!%p498_p2)
}
   0xb   :  { %s502_s2 = scalar_lea.vmem %s20_s21, 256  ;;  %p507_p4 = scmp.lt.s32.totalorder %s20_s21, %s20_s21 }
   0xc   :  { %p503_p3 = scmp.ne.s32.totalorder %s20_s21, %s502_s2  ;;  %p508_p5 = scmp.lt.s32.totalorder %s502_s2, %s502_s2 }
   0xe   :  { %p509_p6 = por %p508_p5, %p507_p4 }
  0x10   :  { %p510_p7 = pnand %p509_p6, %p503_p3 }
  0x12   :  { %513 = shalt.err (!%p510_p7)
}
  0x13   :  { %s541_s29 = smov 128   ;;  %s542_s30 = smov 8  }
  0x14   :  { %25 = dma.hbm_to_vmem [thread:$0]  %s651_s0, 256, %s20_s21, [#allocation4], %s541_s29, %s541_s29, %s542_s30  }
  0x15   :  { %536 = dma.done.wait [#allocation4], 256  }
  0x16   :  { %537 = vsyncadd [#allocation4], 4294967040  ;;  %vm41_vm0 = vcmask 1043456   ;;  %v596_v1 = vld [vmem:[#allocation3] sm:$0xff]  ;;  %v598_v2 = vld [vmem:[#allocation3 + $0x8] sm:$0xff]  ;;  %v543_v11 = vmov 0.0   ;;  %v221_v49 = vlaneseq }
  0x17   :  { %v39_v3 = vcombine.high %v596_v1, %v596_v1  ;;  %v42_v4 = vsel %vm41_vm0, %v596_v1, 0.0  ;;  %v231_v5 = vcombine.high %v598_v2, %v598_v2  ;;  %v233_v7 = vsel %vm41_vm0, %v598_v2, 0.0  ;;  %452 = vmatprep.subr.mxu0 %v543_v11  ;;  %457 = vmatprep.subr.mxu1 %v543_v11  ;;  %v48_v14 = vld [vmem:[%s652_s1] sm:$0x1] }
  0x18   :  { %vm544_vm1 = vmmov 0   ;;  %vm50_vm2 = vcmask 31744   ;;  %v239_v17 = vld [vmem:[%s652_s1] sm:$0x1]  ;;  %vm134_vm3 = vcmask 1040384   ;;  %vm130_vm4 = vcmask 7168  }
  0x19   :  { %v43_v6 = vsel %vm41_vm0, %v39_v3, 0.0  ;;  %v234_v8 = vsel %vm41_vm0, %v231_v5, 0.0  ;;  %454 = vmatprep.mubr.msk.f32.mxu0 %vm544_vm1, %v543_v11  ;;  %459 = vmatprep.mubr.msk.f32.mxu1 %vm544_vm1, %v543_v11  ;;  %v49_v18 = vld [vmem:[#allocation2] sm:$0x1]  ;;  %v545_v30 = vmov 0   ;;  %v222_v51 = vshrl.u32 %v221_v49, 7 }
  0x1a   :  { %v44_v9 = vadd.f32 %v43_v6, %v42_v4  ;;  %v235_v10 = vadd.f32 %v234_v8, %v233_v7  ;;  %v240_v22 = vld [vmem:[#allocation2] sm:$0x1]  ;;  %480 = vset.pattern.permute.xlu1 %v545_v30  ;;  %481 = vset.pattern.permute.xlu0 %v545_v30  ;;  %v546_v47 = vmov 839922192  }
  0x1b   :  { %v128_v24 = vld [vmem:[%s654_s3] sm:$0xf]  ;;  %v219_v48 = vunpack.c.l.s4 %v546_v47 }
  0x1c   :  { %45 = vadd.xlane.f32.xlu0 %v44_v9  ;;  %v318_v29 = vld [vmem:[%s654_s3] sm:$0xf]  ;;  %s547_s3 = smov [#allocation6]  }
  0x1d   :  { %v129_v31 = vld [vmem:[%s655_s4] sm:$0xf]  ;;  %v220_v50 = vunpack.c.0.s8 %v219_v48 }
  0x1e   :  { %v319_v35 = vld [vmem:[%s655_s4] sm:$0xf]  ;;  %s422_s4 = sshll.u32 %s547_s3, 4  ;;  %s423_s4 = int_to_ptr.vmem [resolvable:$true] %s422_s4 }
  0x1f   :  { %v223_v52 = vsub.s32 %v220_v50, %v222_v51  ;;  %s514_s18 = scalar_lea.vmem %s423_s4, 256  ;;  %p519_p9 = scmp.lt.s32.totalorder %s423_s4, %s423_s4 }
  0x20   :  { %236 = vadd.xlane.f32.xlu0 %v235_v10  ;;  %p515_p8 = scmp.ne.s32.totalorder %s423_s4, %s514_s18  ;;  %p520_p10 = scmp.lt.s32.totalorder %s514_s18, %s514_s18 }
  0x22   :  { %p521_p11 = por %p520_p10, %p519_p9 }
  0x24   :  { %p522_p12 = pnand %p521_p11, %p515_p8 }
  0xa9   :  { %v46_v12 = vpop.xlane.xlu0 %45 }
  0xaa   :  { %v47_v13 = vmul.f32 0.00390625, %v46_v12 }
  0xac   :  { %453 = vmatpush3.msk.msra.mxu0 %vm41_vm0, %v47_v13 }
  0xad   :  { %455 = vmatmul.mubr.msk.f32.vlgmr.msra.gmra.mrb[0].mxu0 %vm50_vm2, %v48_v14  ;;  %v237_v15 = vpop.xlane.xlu0 %236  ;;  %462 = vmatprep.subr.mxu0 %v543_v11 }
  0xae   :  { %v238_v16 = vmul.f32 0.00390625, %v237_v15  ;;  %464 = vmatprep.mubr.msk.f32.mxu0 %vm544_vm1, %v543_v11 }
  0xb0   :  { %463 = vmatpush3.msk.msra.mxu0 %vm41_vm0, %v238_v16 }
  0xb1   :  { %465 = vmatmul.mubr.msk.f32.vlgmr.msra.gmra.mrb[2].mxu0 %vm50_vm2, %v239_v17 }
 0x180   :  { %v123_v19 = vpop.f32.mrb[0].mxu0 }
 0x181   :  { %v124_v20 = vadd.f32 %v123_v19, %v49_v18  ;;  %v456_v21 = vpop.f32.mrb[1].mxu0 }
 0x183   :  { %v127_v23 = vmax.f32 %v124_v20, 0.0 }
 0x184   :  { %v313_v25 = vpop.f32.mrb[2].mxu0 }
 0x185   :  { %v314_v26 = vadd.f32 %v313_v25, %v240_v22  ;;  %458 = vmatpush3.msk.msra.mxu1 %vm134_vm3, %v127_v23  ;;  %v466_v27 = vpop.f32.mrb[3].mxu0 }
 0x186   :  { %460 = vmatmul.mubr.msk.f32.vlgmr.msra.gmra.mrb[0].mxu1 %vm130_vm4, %v128_v24  ;;  %467 = vmatprep.subr.mxu1 %v543_v11 }
 0x187   :  { %v317_v28 = vmax.f32 %v314_v26, 0.0  ;;  %469 = vmatprep.mubr.msk.f32.mxu1 %vm544_vm1, %v543_v11 }
 0x189   :  { %468 = vmatpush3.msk.msra.mxu1 %vm134_vm3, %v317_v28 }
 0x18a   :  { %470 = vmatmul.mubr.msk.f32.vlgmr.msra.gmra.mrb[2].mxu1 %vm130_vm4, %v318_v29 }
 0x259   :  { %v204_v32 = vpop.f32.mrb[0].mxu1 }
 0x25a   :  { %v205_v33 = vadd.f32 %v204_v32, %v129_v31  ;;  %v461_v34 = vpop.f32.mrb[1].mxu1 }
 0x25c   :  { %v438_v36 = vmul.f32 -1.442695, %v205_v33 }
 0x25d   :  { %v392_v37 = vpop.f32.mrb[2].mxu1 }
 0x25e   :  { %484 = vpow2.f32 %v438_v36  ;;  %v393_v38 = vadd.f32 %v392_v37, %v319_v35  ;;  %v471_v39 = vpop.f32.mrb[3].mxu1 }
 0x260   :  { %v443_v40 = vmul.f32 -1.442695, %v393_v38 }
 0x262   :  { %486 = vpow2.f32 %v443_v40 }
 0x268   :  { %v485_v41 = vpop.eup %484 }
 0x269   :  { %v211_v42 = vadd.f32 1.0, %v485_v41 }
 0x26b   :  { %488 = vrcp.f32 %v211_v42 }
 0x26c   :  { %v487_v43 = vpop.eup %486 }
 0x26d   :  { %v399_v44 = vadd.f32 1.0, %v487_v43 }
 0x26f   :  { %490 = vrcp.f32 %v399_v44 }
 0x275   :  { %v489_v45 = vpop.eup %488 }
 0x276   :  { %216 = vperm.xlu1 %480, %v489_v45  }
 0x279   :  { %v491_v46 = vpop.eup %490 }
 0x27a   :  { %404 = vperm.xlu1 %480, %v491_v46  }
 0x2f5   :  { %v217_v53 = vpop.permute.xlu1 %216 }
 0x2f6   :  { %v224_v54 = vrot.slane %v217_v53, %v223_v52 }
 0x2f8   :  { %v226_v55 = vmul.f32 %v224_v54, %v596_v1 }
 0x2f9   :  { %v405_v56 = vpop.permute.xlu1 %404 }
 0x2fa   :  { %227 = vst [vmem:[#allocation6] sm:$0xff] %v226_v55  ;;  %v412_v57 = vrot.slane %v405_v56, %v223_v52 }
 0x2fc   :  { %v414_v58 = vmul.f32 %v412_v57, %v598_v2 }
 0x2fe   :  { %416 = vst [vmem:[#allocation6 + $0x8] sm:$0xff] %v414_v58 }
 0x2ff   :  { %525 = shalt.err (!%p522_p12)
}
 0x300   :  { %s526_s21 = scalar_lea.hbm %s656_s5, 256 }
 0x301   :  { %p527_p13 = scmp.ne.s32.totalorder %s656_s5, %s526_s21  ;;  %p530_p0 = scmp.lt.u32.totalorder %s526_s21, %s656_s5 }
 0x303   :  { %p532_p1 = pnand %p530_p0, %p527_p13 }
 0x305   :  { %535 = shalt.err (!%p532_p1)
}
 0x306   :  { %428 = dma.vmem_to_hbm [thread:$0]  %s423_s4, 256, %s656_s5, [#allocation5], %s541_s29, %s541_s29, %s542_s30  }
 0x307   :  { %538 = dma.done.wait [#allocation5], 256  }
 0x308   :  { %539 = vsyncadd [#allocation5], 4294967040 }
 0x309   :  { %432 = vsyncpa [#allocation4], 1 }
 0x30a   :  { %433 = vsyncpa [#allocation5], 1 }

</bundles_post_ra>
